<compile_context>
chip_gen: v6e
topology: v6e:2x2x1
jax: 0.10.0
libtpu: 0.0.40
codegen_flags: <defaults>
</compile_context>

<pallas_src>
import math

import jax
import jax.numpy as jnp
from jax.experimental import pallas as pl
from jax.experimental.pallas import tpu as pltpu


_PARAM_ORDER = ('wqkv', 'bqkv', 'wo', 'bo', 'ln1_g', 'ln1_b',
                'w1', 'b1', 'w2', 'b2', 'ln2_g', 'ln2_b')


def make_encoder_kernel(S, D, H, F, eps=1e-5):
    hd = D // H
    scale = 1.0 / math.sqrt(hd)

    def _layer_norm(x, g, b):
        mu = jnp.mean(x, axis=-1, keepdims=True)
        var = jnp.mean(jnp.square(x - mu), axis=-1, keepdims=True)
        return (x - mu) * jax.lax.rsqrt(var + eps) * g + b

    def kernel(x_ref, mask_ref,
               wqkv_ref, bqkv_ref, wo_ref, bo_ref, ln1g_ref, ln1b_ref,
               w1_ref, b1_ref, w2_ref, b2_ref, ln2g_ref, ln2b_ref,
               o_ref):
        layer = pl.program_id(1)

        # Layer 0: initialize the VMEM-resident carry (the output block) with x.
        @pl.when(layer == 0)
        def _():
            o_ref[...] = x_ref[...]

        x = o_ref[...]                       # (1, S, D) f32 activation carry
        mask = mask_ref[...]                 # (1, 1, S) additive key-padding mask

        # ---- fused QKV projection: one (S,D)@(D,3D) bf16 matmul, f32 accum ----
        x_bf = x.astype(jnp.bfloat16)
        qkv = jnp.einsum('bsd,de->bse', x_bf, wqkv_ref[...],
                         preferred_element_type=jnp.float32) + bqkv_ref[...]

        # ---- attention: static per-head loop on tiny (S,S) score tiles ----
        ctx_heads = []
        for h in range(H):
            qh = qkv[:, :, h * hd:(h + 1) * hd]
            kh = qkv[:, :, D + h * hd:D + (h + 1) * hd]
            vh = qkv[:, :, 2 * D + h * hd:2 * D + (h + 1) * hd]
            s = jnp.einsum('bqe,bke->bqk',
                           qh.astype(jnp.bfloat16), kh.astype(jnp.bfloat16),
                           preferred_element_type=jnp.float32) * scale
            s = s + mask                     # (1,1,S) broadcast over queries
            m = jnp.max(s, axis=-1, keepdims=True)
            p = jnp.exp(s - m)
            p = p * pl.reciprocal(jnp.sum(p, axis=-1, keepdims=True), approx=True)
            ctx_heads.append(
                jnp.einsum('bqk,bke->bqe',
                           p.astype(jnp.bfloat16), vh.astype(jnp.bfloat16),
                           preferred_element_type=jnp.float32))
        ctx = jnp.concatenate(ctx_heads, axis=-1)        # (1, S, D)

        # ---- fused output projection: one (S,D)@(D,D) bf16 matmul ----
        attn = jnp.einsum('bsd,de->bse', ctx.astype(jnp.bfloat16), wo_ref[...],
                          preferred_element_type=jnp.float32) + bo_ref[...]

        # ---- residual + post-LayerNorm (normalize_before=False) ----
        h1 = _layer_norm(x + attn, ln1g_ref[...], ln1b_ref[...])

        # ---- FFN: Linear -> ReLU -> Linear, residual + post-LayerNorm ----
        f = jnp.einsum('bsd,df->bsf', h1.astype(jnp.bfloat16), w1_ref[...],
                       preferred_element_type=jnp.float32) + b1_ref[...]
        f = jnp.maximum(f, 0.0)
        y = jnp.einsum('bsf,fd->bsd', f.astype(jnp.bfloat16), w2_ref[...],
                       preferred_element_type=jnp.float32) + b2_ref[...]

        o_ref[...] = _layer_norm(h1 + y, ln2g_ref[...], ln2b_ref[...])

    return kernel


def transformer_encoder(x, padding_mask, params, n_heads):
    """TransformerEncoder.forward (normalize_before=False => no final norm)."""
    B, S, D = x.shape
    L = params['wqkv'].shape[0]
    F = params['w1'].shape[2]

    # additive key-padding mask, kept (B, 1, S) so the BlockSpec stays tile-legal
    add_mask = jnp.where(padding_mask, -1e9, 0.0).astype(jnp.float32)[:, None, :]

    kernel = make_encoder_kernel(S, D, n_heads, F)

    def layer_spec(shape):
        # stacked per-layer param (L, r, c): take layer l's slab, squeeze lead dim
        return pl.BlockSpec((None,) + tuple(shape[1:]), lambda b, l: (l, 0, 0))

    in_specs = [
        pl.BlockSpec((1, S, D), lambda b, l: (b, 0, 0)),   # x (only read at l==0)
        pl.BlockSpec((1, 1, S), lambda b, l: (b, 0, 0)),   # additive mask
    ] + [layer_spec(params[k].shape) for k in _PARAM_ORDER]

    out_spec = pl.BlockSpec((1, S, D), lambda b, l: (b, 0, 0))  # resident carry

    return pl.pallas_call(
        kernel,
        out_shape=jax.ShapeDtypeStruct((B, S, D), jnp.float32),
        grid=(B, L),
        in_specs=in_specs,
        out_specs=out_spec,
        compiler_params=pltpu.CompilerParams(
            dimension_semantics=("parallel", "arbitrary")),
    )(x, add_mask, *[params[k] for k in _PARAM_ORDER])


# ----------------------------------------------------------------------------
# Deterministic synthetic parameter init (stacked over layers; weights bf16).
# ----------------------------------------------------------------------------
def init_params(key, L, D, H, F):
    s = 0.02
    ks = jax.random.split(key, 4)

    def w(k, shape):
        return (jax.random.normal(k, shape, jnp.float32) * s).astype(jnp.bfloat16)

    return dict(
        wqkv=w(ks[0], (L, D, 3 * D)),
        bqkv=jnp.zeros((L, 1, 3 * D), jnp.float32),
        wo=w(ks[1], (L, D, D)),
        bo=jnp.zeros((L, 1, D), jnp.float32),
        ln1_g=jnp.ones((L, 1, D), jnp.float32),
        ln1_b=jnp.zeros((L, 1, D), jnp.float32),
        w1=w(ks[2], (L, D, F)),
        b1=jnp.zeros((L, 1, F), jnp.float32),
        w2=w(ks[3], (L, F, D)),
        b2=jnp.zeros((L, 1, D), jnp.float32),
        ln2_g=jnp.ones((L, 1, D), jnp.float32),
        ln2_b=jnp.zeros((L, 1, D), jnp.float32),
    )


if __name__ == "__main__":
    # small config: n_layers=2, d_model=32, n_heads=4, d_inner=64, batch=2, seq=8
    B, S, D, H, F, L = 2, 8, 32, 4, 64, 2

    key = jax.random.PRNGKey(0)
    k_x, k_p = jax.random.split(key)
    x = jax.random.normal(k_x, (B, S, D), jnp.float32)

    # padding mask: True = padded (last two keys of batch element 1 are padding)
    padding_mask = jnp.zeros((B, S), dtype=bool).at[1, 6:].set(True)

    params = init_params(k_p, L, D, H, F)

    out = transformer_encoder(x, padding_mask, params, n_heads=H)
    out = jax.block_until_ready(out)

    assert out.shape == (B, S, D)
    assert bool(jnp.all(jnp.isfinite(out)))
    print("KERNEL_OK")
</pallas_src>

<mosaic_0001>
module attributes {stable_mosaic.version = 11 : i64} {
  func.func @kernel(%arg0: i32, %arg1: i32, %arg2: memref<1x8x32xf32, #tpu.memory_space<vmem>>, %arg3: memref<1x1x8xf32, #tpu.memory_space<vmem>>, %arg4: memref<1x32x96xbf16, #tpu.memory_space<vmem>>, %arg5: memref<1x1x96xf32, #tpu.memory_space<vmem>>, %arg6: memref<1x32x32xbf16, #tpu.memory_space<vmem>>, %arg7: memref<1x1x32xf32, #tpu.memory_space<vmem>>, %arg8: memref<1x1x32xf32, #tpu.memory_space<vmem>>, %arg9: memref<1x1x32xf32, #tpu.memory_space<vmem>>, %arg10: memref<1x32x64xbf16, #tpu.memory_space<vmem>>, %arg11: memref<1x1x64xf32, #tpu.memory_space<vmem>>, %arg12: memref<1x64x32xbf16, #tpu.memory_space<vmem>>, %arg13: memref<1x1x32xf32, #tpu.memory_space<vmem>>, %arg14: memref<1x1x32xf32, #tpu.memory_space<vmem>>, %arg15: memref<1x1x32xf32, #tpu.memory_space<vmem>>, %arg16: memref<1x8x32xf32, #tpu.memory_space<vmem>>) attributes {dimension_semantics = [#tpu.dimension_semantics<parallel>, #tpu.dimension_semantics<arbitrary>], iteration_bounds = array<i64: 2, 2>, scalar_prefetch = 0 : i64, scratch_operands = 0 : i64, tpu.core_type = #tpu.core_type<tc>, window_params = [{transform_indices = @transform_0, window_bounds = array<i64: 1, 8, 32>}, {transform_indices = @transform_1, window_bounds = array<i64: 1, 1, 8>}, {transform_indices = @transform_2, window_bounds = array<i64: 1, 32, 96>}, {transform_indices = @transform_3, window_bounds = array<i64: 1, 1, 96>}, {transform_indices = @transform_4, window_bounds = array<i64: 1, 32, 32>}, {transform_indices = @transform_5, window_bounds = array<i64: 1, 1, 32>}, {transform_indices = @transform_6, window_bounds = array<i64: 1, 1, 32>}, {transform_indices = @transform_7, window_bounds = array<i64: 1, 1, 32>}, {transform_indices = @transform_8, window_bounds = array<i64: 1, 32, 64>}, {transform_indices = @transform_9, window_bounds = array<i64: 1, 1, 64>}, {transform_indices = @transform_10, window_bounds = array<i64: 1, 64, 32>}, {transform_indices = @transform_11, window_bounds = array<i64: 1, 1, 32>}, {transform_indices = @transform_12, window_bounds = array<i64: 1, 1, 32>}, {transform_indices = @transform_13, window_bounds = array<i64: 1, 1, 32>}, {transform_indices = @transform_14, window_bounds = array<i64: 1, 8, 32>}]} {
    %c0_i32 = arith.constant 0 : i32
    %0 = arith.cmpi eq, %arg1, %c0_i32 : i32
    %1 = arith.extui %0 : i1 to i32
    %c0_i32_0 = arith.constant 0 : i32
    %2 = arith.cmpi ne, %1, %c0_i32_0 : i32
    scf.if %2 {
      %c0_79 = arith.constant 0 : index
      %c0_80 = arith.constant 0 : index
      %c0_81 = arith.constant 0 : index
      %195 = vector.load %arg2[%c0_79, %c0_80, %c0_81] : memref<1x8x32xf32, #tpu.memory_space<vmem>>, vector<1x8x32xf32>
      %c0_82 = arith.constant 0 : index
      %c0_83 = arith.constant 0 : index
      %c0_84 = arith.constant 0 : index
      %196 = vector.load %arg16[%c0_82, %c0_83, %c0_84] : memref<1x8x32xf32, #tpu.memory_space<vmem>>, vector<1x8x32xf32>
      tpu.vector_store %arg16[%c0_82, %c0_83, %c0_84], %195 {strides = array<i32>} : memref<1x8x32xf32, #tpu.memory_space<vmem>>, vector<1x8x32xf32>,
    } else {
    }
    %c0 = arith.constant 0 : index
    %c0_1 = arith.constant 0 : index
    %c0_2 = arith.constant 0 : index
    %3 = vector.load %arg16[%c0, %c0_1, %c0_2] : memref<1x8x32xf32, #tpu.memory_space<vmem>>, vector<1x8x32xf32>
    %c0_3 = arith.constant 0 : index
    %c0_4 = arith.constant 0 : index
    %c0_5 = arith.constant 0 : index
    %4 = vector.load %arg3[%c0_3, %c0_4, %c0_5] : memref<1x1x8xf32, #tpu.memory_space<vmem>>, vector<1x1x8xf32>
    %5 = arith.truncf %3 : vector<1x8x32xf32> to vector<1x8x32xbf16>
    %c0_6 = arith.constant 0 : index
    %c0_7 = arith.constant 0 : index
    %c0_8 = arith.constant 0 : index
    %6 = vector.load %arg4[%c0_6, %c0_7, %c0_8] : memref<1x32x96xbf16, #tpu.memory_space<vmem>>, vector<1x32x96xbf16>
    %7 = vector.shape_cast %6 : vector<1x32x96xbf16> to vector<32x96xbf16>
    "tpu.trace_start"() <{level = 10 : i32, message = "bsd,de->bse"}> : () -> ()
    %cst = arith.constant dense<0.000000e+00> : vector<1x8x96xf32>
    %8 = tpu.matmul %5, %7, %cst {dimension_numbers = #tpu.dot_dimension_numbers<[2], [0], [0, 1], [1], [0, 0, 0, 1, 1, 1], [], []>} : vector<1x8x32xbf16>, vector<32x96xbf16>, vector<1x8x96xf32> -> vector<1x8x96xf32>
    "tpu.trace_stop"() : () -> ()
    %c0_9 = arith.constant 0 : index
    %c0_10 = arith.constant 0 : index
    %c0_11 = arith.constant 0 : index
    %9 = vector.load %arg5[%c0_9, %c0_10, %c0_11] : memref<1x1x96xf32, #tpu.memory_space<vmem>>, vector<1x1x96xf32>
    %10 = vector.shape_cast %9 : vector<1x1x96xf32> to vector<1x96xf32>
    %11 = vector.shape_cast %10 : vector<1x96xf32> to vector<1x1x96xf32>
    %12 = vector.broadcast %11 : vector<1x1x96xf32> to vector<1x8x96xf32>
    %13 = arith.addf %8, %12 : vector<1x8x96xf32>
    %14 = vector.extract_strided_slice %13 {offsets = [0, 0, 0], sizes = [1, 8, 8], strides = [1, 1, 1]} : vector<1x8x96xf32> to vector<1x8x8xf32>
    %15 = vector.extract_strided_slice %13 {offsets = [0, 0, 32], sizes = [1, 8, 8], strides = [1, 1, 1]} : vector<1x8x96xf32> to vector<1x8x8xf32>
    %16 = vector.extract_strided_slice %13 {offsets = [0, 0, 64], sizes = [1, 8, 8], strides = [1, 1, 1]} : vector<1x8x96xf32> to vector<1x8x8xf32>
    %17 = arith.truncf %14 : vector<1x8x8xf32> to vector<1x8x8xbf16>
    %18 = arith.truncf %15 : vector<1x8x8xf32> to vector<1x8x8xbf16>
    "tpu.trace_start"() <{level = 10 : i32, message = "bqe,bke->bqk"}> : () -> ()
    %cst_12 = arith.constant dense<0.000000e+00> : vector<1x8x8xf32>
    %19 = tpu.matmul %17, %18, %cst_12 {dimension_numbers = #tpu.dot_dimension_numbers<[2], [2], [1], [1], [0, 0, 0, 1, 1, 1], [0], [0]>} : vector<1x8x8xbf16>, vector<1x8x8xbf16>, vector<1x8x8xf32> -> vector<1x8x8xf32>
    "tpu.trace_stop"() : () -> ()
    %cst_13 = arith.constant 0.353553385 : f32
    %20 = vector.broadcast %cst_13 : f32 to vector<1x8x8xf32>
    %21 = arith.mulf %19, %20 : vector<1x8x8xf32>
    %22 = vector.broadcast %4 : vector<1x1x8xf32> to vector<1x8x8xf32>
    %23 = arith.addf %21, %22 : vector<1x8x8xf32>
    %cst_14 = arith.constant dense<0xFF800000> : vector<1x8xf32>
    %24 = vector.multi_reduction <maximumf>, %23, %cst_14 [2] : vector<1x8x8xf32> to vector<1x8xf32>
    %25 = vector.shape_cast %24 : vector<1x8xf32> to vector<1x8x1xf32>
    %26 = vector.broadcast %25 : vector<1x8x1xf32> to vector<1x8x8xf32>
    %27 = arith.subf %23, %26 : vector<1x8x8xf32>
    %28 = math.exp %27 : vector<1x8x8xf32>
    %cst_15 = arith.constant dense<0.000000e+00> : vector<1x8xf32>
    %29 = vector.multi_reduction <add>, %28, %cst_15 [2] : vector<1x8x8xf32> to vector<1x8xf32>
    %30 = vector.shape_cast %29 : vector<1x8xf32> to vector<1x8x1xf32>
    %31 = tpu.reciprocal %30 {approx = true} : vector<1x8x1xf32> -> vector<1x8x1xf32>
    %32 = vector.broadcast %31 : vector<1x8x1xf32> to vector<1x8x8xf32>
    %33 = arith.mulf %28, %32 : vector<1x8x8xf32>
    %34 = arith.truncf %33 : vector<1x8x8xf32> to vector<1x8x8xbf16>
    %35 = arith.truncf %16 : vector<1x8x8xf32> to vector<1x8x8xbf16>
    "tpu.trace_start"() <{level = 10 : i32, message = "bqk,bke->bqe"}> : () -> ()
    %cst_16 = arith.constant dense<0.000000e+00> : vector<1x8x8xf32>
    %36 = tpu.matmul %34, %35, %cst_16 {dimension_numbers = #tpu.dot_dimension_numbers<[2], [1], [1], [2], [0, 0, 0, 1, 1, 2], [0], [0]>} : vector<1x8x8xbf16>, vector<1x8x8xbf16>, vector<1x8x8xf32> -> vector<1x8x8xf32>
    "tpu.trace_stop"() : () -> ()
    %37 = vector.extract_strided_slice %13 {offsets = [0, 0, 8], sizes = [1, 8, 8], strides = [1, 1, 1]} : vector<1x8x96xf32> to vector<1x8x8xf32>
    %38 = vector.extract_strided_slice %13 {offsets = [0, 0, 40], sizes = [1, 8, 8], strides = [1, 1, 1]} : vector<1x8x96xf32> to vector<1x8x8xf32>
    %39 = vector.extract_strided_slice %13 {offsets = [0, 0, 72], sizes = [1, 8, 8], strides = [1, 1, 1]} : vector<1x8x96xf32> to vector<1x8x8xf32>
    %40 = arith.truncf %37 : vector<1x8x8xf32> to vector<1x8x8xbf16>
    %41 = arith.truncf %38 : vector<1x8x8xf32> to vector<1x8x8xbf16>
    "tpu.trace_start"() <{level = 10 : i32, message = "bqe,bke->bqk"}> : () -> ()
    %cst_17 = arith.constant dense<0.000000e+00> : vector<1x8x8xf32>
    %42 = tpu.matmul %40, %41, %cst_17 {dimension_numbers = #tpu.dot_dimension_numbers<[2], [2], [1], [1], [0, 0, 0, 1, 1, 1], [0], [0]>} : vector<1x8x8xbf16>, vector<1x8x8xbf16>, vector<1x8x8xf32> -> vector<1x8x8xf32>
    "tpu.trace_stop"() : () -> ()
    %cst_18 = arith.constant 0.353553385 : f32
    %43 = vector.broadcast %cst_18 : f32 to vector<1x8x8xf32>
    %44 = arith.mulf %42, %43 : vector<1x8x8xf32>
    %45 = vector.broadcast %4 : vector<1x1x8xf32> to vector<1x8x8xf32>
    %46 = arith.addf %44, %45 : vector<1x8x8xf32>
    %cst_19 = arith.constant dense<0xFF800000> : vector<1x8xf32>
    %47 = vector.multi_reduction <maximumf>, %46, %cst_19 [2] : vector<1x8x8xf32> to vector<1x8xf32>
    %48 = vector.shape_cast %47 : vector<1x8xf32> to vector<1x8x1xf32>
    %49 = vector.broadcast %48 : vector<1x8x1xf32> to vector<1x8x8xf32>
    %50 = arith.subf %46, %49 : vector<1x8x8xf32>
    %51 = math.exp %50 : vector<1x8x8xf32>
    %cst_20 = arith.constant dense<0.000000e+00> : vector<1x8xf32>
    %52 = vector.multi_reduction <add>, %51, %cst_20 [2] : vector<1x8x8xf32> to vector<1x8xf32>
    %53 = vector.shape_cast %52 : vector<1x8xf32> to vector<1x8x1xf32>
    %54 = tpu.reciprocal %53 {approx = true} : vector<1x8x1xf32> -> vector<1x8x1xf32>
    %55 = vector.broadcast %54 : vector<1x8x1xf32> to vector<1x8x8xf32>
    %56 = arith.mulf %51, %55 : vector<1x8x8xf32>
    %57 = arith.truncf %56 : vector<1x8x8xf32> to vector<1x8x8xbf16>
    %58 = arith.truncf %39 : vector<1x8x8xf32> to vector<1x8x8xbf16>
    "tpu.trace_start"() <{level = 10 : i32, message = "bqk,bke->bqe"}> : () -> ()
    %cst_21 = arith.constant dense<0.000000e+00> : vector<1x8x8xf32>
    %59 = tpu.matmul %57, %58, %cst_21 {dimension_numbers = #tpu.dot_dimension_numbers<[2], [1], [1], [2], [0, 0, 0, 1, 1, 2], [0], [0]>} : vector<1x8x8xbf16>, vector<1x8x8xbf16>, vector<1x8x8xf32> -> vector<1x8x8xf32>
    "tpu.trace_stop"() : () -> ()
    %60 = vector.extract_strided_slice %13 {offsets = [0, 0, 16], sizes = [1, 8, 8], strides = [1, 1, 1]} : vector<1x8x96xf32> to vector<1x8x8xf32>
    %61 = vector.extract_strided_slice %13 {offsets = [0, 0, 48], sizes = [1, 8, 8], strides = [1, 1, 1]} : vector<1x8x96xf32> to vector<1x8x8xf32>
    %62 = vector.extract_strided_slice %13 {offsets = [0, 0, 80], sizes = [1, 8, 8], strides = [1, 1, 1]} : vector<1x8x96xf32> to vector<1x8x8xf32>
    %63 = arith.truncf %60 : vector<1x8x8xf32> to vector<1x8x8xbf16>
    %64 = arith.truncf %61 : vector<1x8x8xf32> to vector<1x8x8xbf16>
    "tpu.trace_start"() <{level = 10 : i32, message = "bqe,bke->bqk"}> : () -> ()
    %cst_22 = arith.constant dense<0.000000e+00> : vector<1x8x8xf32>
    %65 = tpu.matmul %63, %64, %cst_22 {dimension_numbers = #tpu.dot_dimension_numbers<[2], [2], [1], [1], [0, 0, 0, 1, 1, 1], [0], [0]>} : vector<1x8x8xbf16>, vector<1x8x8xbf16>, vector<1x8x8xf32> -> vector<1x8x8xf32>
    "tpu.trace_stop"() : () -> ()
    %cst_23 = arith.constant 0.353553385 : f32
    %66 = vector.broadcast %cst_23 : f32 to vector<1x8x8xf32>
    %67 = arith.mulf %65, %66 : vector<1x8x8xf32>
    %68 = vector.broadcast %4 : vector<1x1x8xf32> to vector<1x8x8xf32>
    %69 = arith.addf %67, %68 : vector<1x8x8xf32>
    %cst_24 = arith.constant dense<0xFF800000> : vector<1x8xf32>
    %70 = vector.multi_reduction <maximumf>, %69, %cst_24 [2] : vector<1x8x8xf32> to vector<1x8xf32>
    %71 = vector.shape_cast %70 : vector<1x8xf32> to vector<1x8x1xf32>
    %72 = vector.broadcast %71 : vector<1x8x1xf32> to vector<1x8x8xf32>
    %73 = arith.subf %69, %72 : vector<1x8x8xf32>
    %74 = math.exp %73 : vector<1x8x8xf32>
    %cst_25 = arith.constant dense<0.000000e+00> : vector<1x8xf32>
    %75 = vector.multi_reduction <add>, %74, %cst_25 [2] : vector<1x8x8xf32> to vector<1x8xf32>
    %76 = vector.shape_cast %75 : vector<1x8xf32> to vector<1x8x1xf32>
    %77 = tpu.reciprocal %76 {approx = true} : vector<1x8x1xf32> -> vector<1x8x1xf32>
    %78 = vector.broadcast %77 : vector<1x8x1xf32> to vector<1x8x8xf32>
    %79 = arith.mulf %74, %78 : vector<1x8x8xf32>
    %80 = arith.truncf %79 : vector<1x8x8xf32> to vector<1x8x8xbf16>
    %81 = arith.truncf %62 : vector<1x8x8xf32> to vector<1x8x8xbf16>
    "tpu.trace_start"() <{level = 10 : i32, message = "bqk,bke->bqe"}> : () -> ()
    %cst_26 = arith.constant dense<0.000000e+00> : vector<1x8x8xf32>
    %82 = tpu.matmul %80, %81, %cst_26 {dimension_numbers = #tpu.dot_dimension_numbers<[2], [1], [1], [2], [0, 0, 0, 1, 1, 2], [0], [0]>} : vector<1x8x8xbf16>, vector<1x8x8xbf16>, vector<1x8x8xf32> -> vector<1x8x8xf32>
    "tpu.trace_stop"() : () -> ()
    %83 = vector.extract_strided_slice %13 {offsets = [0, 0, 24], sizes = [1, 8, 8], strides = [1, 1, 1]} : vector<1x8x96xf32> to vector<1x8x8xf32>
    %84 = vector.extract_strided_slice %13 {offsets = [0, 0, 56], sizes = [1, 8, 8], strides = [1, 1, 1]} : vector<1x8x96xf32> to vector<1x8x8xf32>
    %85 = vector.extract_strided_slice %13 {offsets = [0, 0, 88], sizes = [1, 8, 8], strides = [1, 1, 1]} : vector<1x8x96xf32> to vector<1x8x8xf32>
    %86 = arith.truncf %83 : vector<1x8x8xf32> to vector<1x8x8xbf16>
    %87 = arith.truncf %84 : vector<1x8x8xf32> to vector<1x8x8xbf16>
    "tpu.trace_start"() <{level = 10 : i32, message = "bqe,bke->bqk"}> : () -> ()
    %cst_27 = arith.constant dense<0.000000e+00> : vector<1x8x8xf32>
    %88 = tpu.matmul %86, %87, %cst_27 {dimension_numbers = #tpu.dot_dimension_numbers<[2], [2], [1], [1], [0, 0, 0, 1, 1, 1], [0], [0]>} : vector<1x8x8xbf16>, vector<1x8x8xbf16>, vector<1x8x8xf32> -> vector<1x8x8xf32>
    "tpu.trace_stop"() : () -> ()
    %cst_28 = arith.constant 0.353553385 : f32
    %89 = vector.broadcast %cst_28 : f32 to vector<1x8x8xf32>
    %90 = arith.mulf %88, %89 : vector<1x8x8xf32>
    %91 = vector.broadcast %4 : vector<1x1x8xf32> to vector<1x8x8xf32>
    %92 = arith.addf %90, %91 : vector<1x8x8xf32>
    %cst_29 = arith.constant dense<0xFF800000> : vector<1x8xf32>
    %93 = vector.multi_reduction <maximumf>, %92, %cst_29 [2] : vector<1x8x8xf32> to vector<1x8xf32>
    %94 = vector.shape_cast %93 : vector<1x8xf32> to vector<1x8x1xf32>
    %95 = vector.broadcast %94 : vector<1x8x1xf32> to vector<1x8x8xf32>
    %96 = arith.subf %92, %95 : vector<1x8x8xf32>
    %97 = math.exp %96 : vector<1x8x8xf32>
    %cst_30 = arith.constant dense<0.000000e+00> : vector<1x8xf32>
    %98 = vector.multi_reduction <add>, %97, %cst_30 [2] : vector<1x8x8xf32> to vector<1x8xf32>
    %99 = vector.shape_cast %98 : vector<1x8xf32> to vector<1x8x1xf32>
    %100 = tpu.reciprocal %99 {approx = true} : vector<1x8x1xf32> -> vector<1x8x1xf32>
    %101 = vector.broadcast %100 : vector<1x8x1xf32> to vector<1x8x8xf32>
    %102 = arith.mulf %97, %101 : vector<1x8x8xf32>
    %103 = arith.truncf %102 : vector<1x8x8xf32> to vector<1x8x8xbf16>
    %104 = arith.truncf %85 : vector<1x8x8xf32> to vector<1x8x8xbf16>
    "tpu.trace_start"() <{level = 10 : i32, message = "bqk,bke->bqe"}> : () -> ()
    %cst_31 = arith.constant dense<0.000000e+00> : vector<1x8x8xf32>
    %105 = tpu.matmul %103, %104, %cst_31 {dimension_numbers = #tpu.dot_dimension_numbers<[2], [1], [1], [2], [0, 0, 0, 1, 1, 2], [0], [0]>} : vector<1x8x8xbf16>, vector<1x8x8xbf16>, vector<1x8x8xf32> -> vector<1x8x8xf32>
    "tpu.trace_stop"() : () -> ()
    %106 = tpu.concatenate %36, %59, %82, %105 in 2 : vector<1x8x8xf32>, vector<1x8x8xf32>, vector<1x8x8xf32>, vector<1x8x8xf32> -> vector<1x8x32xf32>
    %107 = arith.truncf %106 : vector<1x8x32xf32> to vector<1x8x32xbf16>
    %c0_32 = arith.constant 0 : index
    %c0_33 = arith.constant 0 : index
    %c0_34 = arith.constant 0 : index
    %108 = vector.load %arg6[%c0_32, %c0_33, %c0_34] : memref<1x32x32xbf16, #tpu.memory_space<vmem>>, vector<1x32x32xbf16>
    %109 = vector.shape_cast %108 : vector<1x32x32xbf16> to vector<32x32xbf16>
    "tpu.trace_start"() <{level = 10 : i32, message = "bsd,de->bse"}> : () -> ()
    %cst_35 = arith.constant dense<0.000000e+00> : vector<1x8x32xf32>
    %110 = tpu.matmul %107, %109, %cst_35 {dimension_numbers = #tpu.dot_dimension_numbers<[2], [0], [0, 1], [1], [0, 0, 0, 1, 1, 1], [], []>} : vector<1x8x32xbf16>, vector<32x32xbf16>, vector<1x8x32xf32> -> vector<1x8x32xf32>
    "tpu.trace_stop"() : () -> ()
    %c0_36 = arith.constant 0 : index
    %c0_37 = arith.constant 0 : index
    %c0_38 = arith.constant 0 : index
    %111 = vector.load %arg7[%c0_36, %c0_37, %c0_38] : memref<1x1x32xf32, #tpu.memory_space<vmem>>, vector<1x1x32xf32>
    %112 = vector.shape_cast %111 : vector<1x1x32xf32> to vector<1x32xf32>
    %113 = vector.shape_cast %112 : vector<1x32xf32> to vector<1x1x32xf32>
    %114 = vector.broadcast %113 : vector<1x1x32xf32> to vector<1x8x32xf32>
    %115 = arith.addf %110, %114 : vector<1x8x32xf32>
    %116 = arith.addf %3, %115 : vector<1x8x32xf32>
    %c0_39 = arith.constant 0 : index
    %c0_40 = arith.constant 0 : index
    %c0_41 = arith.constant 0 : index
    %117 = vector.load %arg8[%c0_39, %c0_40, %c0_41] : memref<1x1x32xf32, #tpu.memory_space<vmem>>, vector<1x1x32xf32>
    %118 = vector.shape_cast %117 : vector<1x1x32xf32> to vector<1x32xf32>
    %c0_42 = arith.constant 0 : index
    %c0_43 = arith.constant 0 : index
    %c0_44 = arith.constant 0 : index
    %119 = vector.load %arg9[%c0_42, %c0_43, %c0_44] : memref<1x1x32xf32, #tpu.memory_space<vmem>>, vector<1x1x32xf32>
    %120 = vector.shape_cast %119 : vector<1x1x32xf32> to vector<1x32xf32>
    %cst_45 = arith.constant dense<0.000000e+00> : vector<1x8xf32>
    %121 = vector.multi_reduction <add>, %116, %cst_45 [2] : vector<1x8x32xf32> to vector<1x8xf32>
    %122 = vector.shape_cast %121 : vector<1x8xf32> to vector<1x8x1xf32>
    %cst_46 = arith.constant 3.200000e+01 : f32
    %123 = vector.broadcast %cst_46 : f32 to vector<1x8x1xf32>
    %124 = arith.divf %122, %123 : vector<1x8x1xf32>
    %125 = vector.broadcast %124 : vector<1x8x1xf32> to vector<1x8x32xf32>
    %126 = arith.subf %116, %125 : vector<1x8x32xf32>
    %127 = arith.mulf %126, %126 : vector<1x8x32xf32>
    %cst_47 = arith.constant dense<0.000000e+00> : vector<1x8xf32>
    %128 = vector.multi_reduction <add>, %127, %cst_47 [2] : vector<1x8x32xf32> to vector<1x8xf32>
    %129 = vector.shape_cast %128 : vector<1x8xf32> to vector<1x8x1xf32>
    %cst_48 = arith.constant 3.200000e+01 : f32
    %130 = vector.broadcast %cst_48 : f32 to vector<1x8x1xf32>
    %131 = arith.divf %129, %130 : vector<1x8x1xf32>
    %132 = vector.broadcast %124 : vector<1x8x1xf32> to vector<1x8x32xf32>
    %133 = arith.subf %116, %132 : vector<1x8x32xf32>
    %cst_49 = arith.constant 9.99999974E-6 : f32
    %134 = vector.broadcast %cst_49 : f32 to vector<1x8x1xf32>
    %135 = arith.addf %131, %134 : vector<1x8x1xf32>
    %136 = math.rsqrt %135 : vector<1x8x1xf32>
    %137 = vector.broadcast %136 : vector<1x8x1xf32> to vector<1x8x32xf32>
    %138 = arith.mulf %133, %137 : vector<1x8x32xf32>
    %139 = vector.shape_cast %118 : vector<1x32xf32> to vector<1x1x32xf32>
    %140 = vector.broadcast %139 : vector<1x1x32xf32> to vector<1x8x32xf32>
    %141 = arith.mulf %138, %140 : vector<1x8x32xf32>
    %142 = vector.shape_cast %120 : vector<1x32xf32> to vector<1x1x32xf32>
    %143 = vector.broadcast %142 : vector<1x1x32xf32> to vector<1x8x32xf32>
    %144 = arith.addf %141, %143 : vector<1x8x32xf32>
    %145 = arith.truncf %144 : vector<1x8x32xf32> to vector<1x8x32xbf16>
    %c0_50 = arith.constant 0 : index
    %c0_51 = arith.constant 0 : index
    %c0_52 = arith.constant 0 : index
    %146 = vector.load %arg10[%c0_50, %c0_51, %c0_52] : memref<1x32x64xbf16, #tpu.memory_space<vmem>>, vector<1x32x64xbf16>
    %147 = vector.shape_cast %146 : vector<1x32x64xbf16> to vector<32x64xbf16>
    "tpu.trace_start"() <{level = 10 : i32, message = "bsd,df->bsf"}> : () -> ()
    %cst_53 = arith.constant dense<0.000000e+00> : vector<1x8x64xf32>
    %148 = tpu.matmul %145, %147, %cst_53 {dimension_numbers = #tpu.dot_dimension_numbers<[2], [0], [0, 1], [1], [0, 0, 0, 1, 1, 1], [], []>} : vector<1x8x32xbf16>, vector<32x64xbf16>, vector<1x8x64xf32> -> vector<1x8x64xf32>
    "tpu.trace_stop"() : () -> ()
    %c0_54 = arith.constant 0 : index
    %c0_55 = arith.constant 0 : index
    %c0_56 = arith.constant 0 : index
    %149 = vector.load %arg11[%c0_54, %c0_55, %c0_56] : memref<1x1x64xf32, #tpu.memory_space<vmem>>, vector<1x1x64xf32>
    %150 = vector.shape_cast %149 : vector<1x1x64xf32> to vector<1x64xf32>
    %151 = vector.shape_cast %150 : vector<1x64xf32> to vector<1x1x64xf32>
    %152 = vector.broadcast %151 : vector<1x1x64xf32> to vector<1x8x64xf32>
    %153 = arith.addf %148, %152 : vector<1x8x64xf32>
    %cst_57 = arith.constant 0.000000e+00 : f32
    %154 = vector.broadcast %cst_57 : f32 to vector<1x8x64xf32>
    %155 = arith.maximumf %153, %154 : vector<1x8x64xf32>
    %156 = arith.truncf %155 : vector<1x8x64xf32> to vector<1x8x64xbf16>
    %c0_58 = arith.constant 0 : index
    %c0_59 = arith.constant 0 : index
    %c0_60 = arith.constant 0 : index
    %157 = vector.load %arg12[%c0_58, %c0_59, %c0_60] : memref<1x64x32xbf16, #tpu.memory_space<vmem>>, vector<1x64x32xbf16>
    %158 = vector.shape_cast %157 : vector<1x64x32xbf16> to vector<64x32xbf16>
    "tpu.trace_start"() <{level = 10 : i32, message = "bsf,fd->bsd"}> : () -> ()
    %cst_61 = arith.constant dense<0.000000e+00> : vector<1x8x32xf32>
    %159 = tpu.matmul %156, %158, %cst_61 {dimension_numbers = #tpu.dot_dimension_numbers<[2], [0], [0, 1], [1], [0, 0, 0, 1, 1, 1], [], []>} : vector<1x8x64xbf16>, vector<64x32xbf16>, vector<1x8x32xf32> -> vector<1x8x32xf32>
    "tpu.trace_stop"() : () -> ()
    %c0_62 = arith.constant 0 : index
    %c0_63 = arith.constant 0 : index
    %c0_64 = arith.constant 0 : index
    %160 = vector.load %arg13[%c0_62, %c0_63, %c0_64] : memref<1x1x32xf32, #tpu.memory_space<vmem>>, vector<1x1x32xf32>
    %161 = vector.shape_cast %160 : vector<1x1x32xf32> to vector<1x32xf32>
    %162 = vector.shape_cast %161 : vector<1x32xf32> to vector<1x1x32xf32>
    %163 = vector.broadcast %162 : vector<1x1x32xf32> to vector<1x8x32xf32>
    %164 = arith.addf %159, %163 : vector<1x8x32xf32>
    %165 = arith.addf %144, %164 : vector<1x8x32xf32>
    %c0_65 = arith.constant 0 : index
    %c0_66 = arith.constant 0 : index
    %c0_67 = arith.constant 0 : index
    %166 = vector.load %arg14[%c0_65, %c0_66, %c0_67] : memref<1x1x32xf32, #tpu.memory_space<vmem>>, vector<1x1x32xf32>
    %167 = vector.shape_cast %166 : vector<1x1x32xf32> to vector<1x32xf32>
    %c0_68 = arith.constant 0 : index
    %c0_69 = arith.constant 0 : index
    %c0_70 = arith.constant 0 : index
    %168 = vector.load %arg15[%c0_68, %c0_69, %c0_70] : memref<1x1x32xf32, #tpu.memory_space<vmem>>, vector<1x1x32xf32>
    %169 = vector.shape_cast %168 : vector<1x1x32xf32> to vector<1x32xf32>
    %cst_71 = arith.constant dense<0.000000e+00> : vector<1x8xf32>
    %170 = vector.multi_reduction <add>, %165, %cst_71 [2] : vector<1x8x32xf32> to vector<1x8xf32>
    %171 = vector.shape_cast %170 : vector<1x8xf32> to vector<1x8x1xf32>
    %cst_72 = arith.constant 3.200000e+01 : f32
    %172 = vector.broadcast %cst_72 : f32 to vector<1x8x1xf32>
    %173 = arith.divf %171, %172 : vector<1x8x1xf32>
    %174 = vector.broadcast %173 : vector<1x8x1xf32> to vector<1x8x32xf32>
    %175 = arith.subf %165, %174 : vector<1x8x32xf32>
    %176 = arith.mulf %175, %175 : vector<1x8x32xf32>
    %cst_73 = arith.constant dense<0.000000e+00> : vector<1x8xf32>
    %177 = vector.multi_reduction <add>, %176, %cst_73 [2] : vector<1x8x32xf32> to vector<1x8xf32>
    %178 = vector.shape_cast %177 : vector<1x8xf32> to vector<1x8x1xf32>
    %cst_74 = arith.constant 3.200000e+01 : f32
    %179 = vector.broadcast %cst_74 : f32 to vector<1x8x1xf32>
    %180 = arith.divf %178, %179 : vector<1x8x1xf32>
    %181 = vector.broadcast %173 : vector<1x8x1xf32> to vector<1x8x32xf32>
    %182 = arith.subf %165, %181 : vector<1x8x32xf32>
    %cst_75 = arith.constant 9.99999974E-6 : f32
    %183 = vector.broadcast %cst_75 : f32 to vector<1x8x1xf32>
    %184 = arith.addf %180, %183 : vector<1x8x1xf32>
    %185 = math.rsqrt %184 : vector<1x8x1xf32>
    %186 = vector.broadcast %185 : vector<1x8x1xf32> to vector<1x8x32xf32>
    %187 = arith.mulf %182, %186 : vector<1x8x32xf32>
    %188 = vector.shape_cast %167 : vector<1x32xf32> to vector<1x1x32xf32>
    %189 = vector.broadcast %188 : vector<1x1x32xf32> to vector<1x8x32xf32>
    %190 = arith.mulf %187, %189 : vector<1x8x32xf32>
    %191 = vector.shape_cast %169 : vector<1x32xf32> to vector<1x1x32xf32>
    %192 = vector.broadcast %191 : vector<1x1x32xf32> to vector<1x8x32xf32>
    %193 = arith.addf %190, %192 : vector<1x8x32xf32>
    %c0_76 = arith.constant 0 : index
    %c0_77 = arith.constant 0 : index
    %c0_78 = arith.constant 0 : index
    %194 = vector.load %arg16[%c0_76, %c0_77, %c0_78] : memref<1x8x32xf32, #tpu.memory_space<vmem>>, vector<1x8x32xf32>
    tpu.vector_store %arg16[%c0_76, %c0_77, %c0_78], %193 {strides = array<i32>} : memref<1x8x32xf32, #tpu.memory_space<vmem>>, vector<1x8x32xf32>,
    return
  }
  func.func @transform_0(%arg0: i32, %arg1: i32) -> (i32, i32, i32) {
    %c0_i32 = arith.constant 0 : i32
    %c0_i32_0 = arith.constant 0 : i32
    %c0_i32_1 = arith.constant 0 : i32
    return %arg0, %c0_i32, %c0_i32_0 : i32, i32, i32
  }
  func.func @transform_1(%arg0: i32, %arg1: i32) -> (i32, i32, i32) {
    %c0_i32 = arith.constant 0 : i32
    %c0_i32_0 = arith.constant 0 : i32
    %c0_i32_1 = arith.constant 0 : i32
    return %arg0, %c0_i32, %c0_i32_0 : i32, i32, i32
  }
  func.func @transform_2(%arg0: i32, %arg1: i32) -> (i32, i32, i32) {
    %c0_i32 = arith.constant 0 : i32
    %c0_i32_0 = arith.constant 0 : i32
    %c0_i32_1 = arith.constant 0 : i32
    return %arg1, %c0_i32, %c0_i32_0 : i32, i32, i32
  }
  func.func @transform_3(%arg0: i32, %arg1: i32) -> (i32, i32, i32) {
    %c0_i32 = arith.constant 0 : i32
    %c0_i32_0 = arith.constant 0 : i32
    %c0_i32_1 = arith.constant 0 : i32
    return %arg1, %c0_i32, %c0_i32_0 : i32, i32, i32
  }
  func.func @transform_4(%arg0: i32, %arg1: i32) -> (i32, i32, i32) {
    %c0_i32 = arith.constant 0 : i32
    %c0_i32_0 = arith.constant 0 : i32
    %c0_i32_1 = arith.constant 0 : i32
    return %arg1, %c0_i32, %c0_i32_0 : i32, i32, i32
  }
  func.func @transform_5(%arg0: i32, %arg1: i32) -> (i32, i32, i32) {
    %c0_i32 = arith.constant 0 : i32
    %c0_i32_0 = arith.constant 0 : i32
    %c0_i32_1 = arith.constant 0 : i32
    return %arg1, %c0_i32, %c0_i32_0 : i32, i32, i32
  }
  func.func @transform_6(%arg0: i32, %arg1: i32) -> (i32, i32, i32) {
    %c0_i32 = arith.constant 0 : i32
    %c0_i32_0 = arith.constant 0 : i32
    %c0_i32_1 = arith.constant 0 : i32
    return %arg1, %c0_i32, %c0_i32_0 : i32, i32, i32
  }
  func.func @transform_7(%arg0: i32, %arg1: i32) -> (i32, i32, i32) {
    %c0_i32 = arith.constant 0 : i32
    %c0_i32_0 = arith.constant 0 : i32
    %c0_i32_1 = arith.constant 0 : i32
    return %arg1, %c0_i32, %c0_i32_0 : i32, i32, i32
  }
  func.func @transform_8(%arg0: i32, %arg1: i32) -> (i32, i32, i32) {
    %c0_i32 = arith.constant 0 : i32
    %c0_i32_0 = arith.constant 0 : i32
    %c0_i32_1 = arith.constant 0 : i32
    return %arg1, %c0_i32, %c0_i32_0 : i32, i32, i32
  }
  func.func @transform_9(%arg0: i32, %arg1: i32) -> (i32, i32, i32) {
    %c0_i32 = arith.constant 0 : i32
    %c0_i32_0 = arith.constant 0 : i32
    %c0_i32_1 = arith.constant 0 : i32
    return %arg1, %c0_i32, %c0_i32_0 : i32, i32, i32
  }
  func.func @transform_10(%arg0: i32, %arg1: i32) -> (i32, i32, i32) {
    %c0_i32 = arith.constant 0 : i32
    %c0_i32_0 = arith.constant 0 : i32
    %c0_i32_1 = arith.constant 0 : i32
    return %arg1, %c0_i32, %c0_i32_0 : i32, i32, i32
  }
  func.func @transform_11(%arg0: i32, %arg1: i32) -> (i32, i32, i32) {
    %c0_i32 = arith.constant 0 : i32
    %c0_i32_0 = arith.constant 0 : i32
    %c0_i32_1 = arith.constant 0 : i32
    return %arg1, %c0_i32, %c0_i32_0 : i32, i32, i32
  }
  func.func @transform_12(%arg0: i32, %arg1: i32) -> (i32, i32, i32) {
    %c0_i32 = arith.constant 0 : i32
    %c0_i32_0 = arith.constant 0 : i32
    %c0_i32_1 = arith.constant 0 : i32
    return %arg1, %c0_i32, %c0_i32_0 : i32, i32, i32
  }
  func.func @transform_13(%arg0: i32, %arg1: i32) -> (i32, i32, i32) {
    %c0_i32 = arith.constant 0 : i32
    %c0_i32_0 = arith.constant 0 : i32
    %c0_i32_1 = arith.constant 0 : i32
    return %arg1, %c0_i32, %c0_i32_0 : i32, i32, i32
  }
  func.func @transform_14(%arg0: i32, %arg1: i32) -> (i32, i32, i32) {
    %c0_i32 = arith.constant 0 : i32
    %c0_i32_0 = arith.constant 0 : i32
    %c0_i32_1 = arith.constant 0 : i32
    return %arg0, %c0_i32, %c0_i32_0 : i32, i32, i32
  }
}

</mosaic_0001>

<bundles_post_ra>
// kernel: tpu_custom_call.1
= control target key start
LH: loop header
LB: loop body
LE: loop exit
PB: predicated region body
PF: predicated region fallthrough
CT: control target
= control target key end

     0   :  { %s2730_s0 = inlined_call_operand.hbm [shape: f32[2,8,32], index: 0, kind: input, shape index: {}]   ;;  %s2731_s1 = inlined_call_operand.hbm [shape: f32[2,1,8], index: 1, kind: input, shape index: {}]   ;;  %s2732_s2 = inlined_call_operand.vmem [shape: bf16[2,32,96], index: 2, kind: input, shape index: {}]   ;;  %s2733_s3 = inlined_call_operand.vmem [shape: f32[2,1,96], index: 3, kind: input, shape index: {}]   ;;  %s2734_s4 = inlined_call_operand.vmem [shape: bf16[2,32,32], index: 4, kind: input, shape index: {}]   ;;  %s2735_s5 = inlined_call_operand.vmem [shape: f32[2,1,32], index: 5, kind: input, shape index: {}]   ;;  %s2736_s6 = inlined_call_operand.vmem [shape: f32[2,1,32], index: 6, kind: input, shape index: {}]   ;;  %s2737_s7 = inlined_call_operand.vmem [shape: f32[2,1,32], index: 7, kind: input, shape index: {}]   ;;  %s2738_s8 = inlined_call_operand.vmem [shape: bf16[2,32,64], index: 8, kind: input, shape index: {}]   ;;  %s2739_s9 = inlined_call_operand.vmem [shape: f32[2,1,64], index: 9, kind: input, shape index: {}]   ;;  %s2740_s10 = inlined_call_operand.vmem [shape: bf16[2,64,32], index: 10, kind: input, shape index: {}]   ;;  %s2741_s11 = inlined_call_operand.vmem [shape: f32[2,1,32], index: 11, kind: input, shape index: {}]   ;;  %s2742_s12 = inlined_call_operand.vmem [shape: f32[2,1,32], index: 12, kind: input, shape index: {}]   ;;  %s2743_s13 = inlined_call_operand.vmem [shape: f32[2,1,32], index: 13, kind: input, shape index: {}]   ;;  %s2744_s14 = inlined_call_operand.hbm [shape: f32[2,8,32], index: 14, kind: output, shape index: {}]  }
   0x1   :  { %2759 = sst [smem:[#allocation24_spill]] %s2730_s0 }
   0x2   :  { %2760 = sst [smem:[#allocation25_spill]] %s2731_s1 }
   0x3   :  { %2761 = sst [smem:[#allocation26_spill]] %s2732_s2 }
   0x4   :  { %2762 = sst [smem:[#allocation27_spill]] %s2734_s4 }
   0x5   :  { %2763 = sst [smem:[#allocation28_spill]] %s2737_s7 }
   0x6   :  { %2764 = sst [smem:[#allocation29_spill]] %s2738_s8 }
   0x7   :  { %2765 = sst [smem:[#allocation30_spill]] %s2742_s12 }
   0x8   :  { %2766 = sst [smem:[#allocation31_spill]] %s2743_s13 }
   0x9   :  { %2767 = sst [smem:[#allocation32_spill]] %s2744_s14 }
   0xa   :  { %19 = vsyncpa [#allocation3], 0 }
   0xb   :  { %21 = vsyncpa [#allocation3 + $0x1], 0 }
   0xc   :  { %22 = vsyncpa [#allocation6], 0 }
   0xd   :  { %24 = vsyncpa [#allocation6 + $0x1], 0 }
   0xe   :  { %25 = vsyncpa [#allocation4], 0 }
   0xf   :  { %27 = vsyncpa [#allocation4 + $0x1], 0  ;;  %s2341_s29 = smov 0   ;;  %s2343_s30 = smov 0  }
  0x10   :  { %s2345_s15 = smov 0   ;;  %s2347_s16 = smov 0  }
  0x11   :  { %s2349_s17 = smov 0   ;;  %s2351_s18 = smov 0  }
  0x12   :  { %s2353_s19 = smov 0   ;;  %s2355_s20 = smov 0  }
  0x13 LB: > { %2768 = sst [smem:[#allocation11_spill]] %s2217_s29  ;;  %s1788_s21 = sadd.s32 4294967295, %s2245_s20   ;;  %s2245_s20 = sphi %s2355_s20, %s33_s20   ;;  %s2241_s19 = sphi %s2353_s19, %s2816_s19   ;;  %s2237_s18 = sphi %s2351_s18, %s2815_s18   ;;  %s2233_s17 = sphi %s2349_s17, %s2814_s17   ;;  %s2229_s16 = sphi %s2347_s16, %s2813_s16   ;;  %s2225_s15 = sphi %s2345_s15, %s2812_s15   ;;  %s2221_s30 = sphi %s2343_s30, %s2811_s30   ;;  %s2217_s29 = sphi %s2341_s29, %s2810_s29  }
  0x14   : > { %2769 = sst [smem:[#allocation12_spill]] %s2221_s30  ;;  %s1789_s22 = sadd.s32 4294967294, %s2245_s20  }
  0x15   : > { %2770 = sst [smem:[#allocation13_spill]] %s2225_s15  ;;  %s42_s23 = sadd.s32 1, %s2237_s18 }
  0x16   : > { %2771 = sst [smem:[#allocation14_spill]] %s2233_s17  ;;  %s45_s24 = sadd.s32 1, %s2241_s19 }
  0x17   : > { %2772 = sst [smem:[#allocation15_spill]] %s2237_s18  ;;  %p43_p0 = scmp.ge.s32.totalorder %s42_s23, 2 }
  0x18   : > { %2773 = sst [smem:[#allocation16_spill]] %s2241_s19  ;;  %s52_s25 = sadd.s32 1, %s2225_s15 }
  0x19   : > { %2774 = sst [smem:[#allocation17_spill]] %s2245_s20  ;;  %p59_p1 = scmp.ne.s32.totalorder %s2225_s15, %s2221_s30 }
  0x1a   : > { %p60_p2 = scmp.eq.s32.totalorder %s2245_s20, 0  ;;  %s2818_s23 = smov (%p43_p0, %s42_s23), 0 }
  0x1b   : > { %2775 = sst [smem:[#allocation18_spill]] %s2818_s23  ;;  %s2820_s24 = smov (!%p43_p0, %s45_s24), %s2241_s19 }
  0x1c   : > { %p2392_p3 = por %p60_p2, %p59_p1  ;;  %p65_p4 = scmp.ne.s32.totalorder %s2221_s30, %s2217_s29 }
  0x1d   : > { %p47_p5 = scmp.ge.s32.totalorder %s2820_s24, 2  ;;  %p66_p6 = scmp.eq.s32.totalorder %s1788_s21, 0 }
  0x1e   : > { %p427_p7 = scmp.eq.s32.totalorder %s1788_s21, 3  ;;  %p433_p8 = scmp.eq.s32.totalorder %s1789_s22, 3 }
  0x1f   : > { %s2822_s24 = smov (%p47_p5, %s2820_s24), 0  ;;  %p2400_p9 = por %p66_p6, %p65_p4 }
  0x20   : > { %2777 = sst [smem:[#allocation19_spill]] %s2822_s24  ;;  %p2404_p10 = por %p427_p7, %p59_p1 }
  0x21   : > { %s49_s23 = ssub.s32 %s2241_s19, %s2822_s24  ;;  %p2410_p11 = por %p433_p8, %p65_p4 }
  0x22   : > { %s2779_s28 = scalar_select %p2404_p10, 1, 0 }
  0x23   : > { %s2781_s18 = scalar_select %p2410_p11, 1, 0 }
  0x24   : > { %2780 = sst [smem:[#allocation20_spill]] %s2779_s28  ;;  %p50_p12 = scmp.eq.s32.totalorder %s49_s23, 0 }
  0x25   : > { %2782 = sst [smem:[#allocation21_spill]] %s2781_s18  ;;  %p1977_p13 = scmp.lt.s32.totalorder %s2245_s20, 4 }
  0x26   : > { %s2416_s21 = sand.u32 1, %s2225_s15   ;;  %s1793_s14 = sshll.u32 %s2241_s19, 7 }
  0x27   : > { %s2419_s22 = scalar_select %p50_p12, %s2225_s15, %s52_s25  }
  0x28   : > { %s1792_s29 = sshll.u32 %s2416_s21, 3  ;;  %s2784_s0 = sld [smem:[#allocation24_spill]] }
  0x29   : > { %2783 = sst [smem:[#allocation22_spill]] %s2419_s22  ;;  %s457_s28 = scalar_lea.vmem [#allocation2], %s1792_s29 }
  0x2a   : > { %s464_s24 = sshll.u32 %s457_s28, 4  ;;  %p2428_p0 = pnand %p1977_p13, %p2392_p3  ;;  %s465_s24 = int_to_ptr.vmem [resolvable:$true] %s464_s24 }
  0x2b   : > { %p1795_p1 = scmp.ge.s32.totalorder %s2245_s20, 1  ;;  %p566_p2 = scmp.lt.s32.totalorder %s2245_s20, 5 }
  0x2c   : > { %s454_s23 = scalar_lea.sflag [#allocation3], %s2416_s21  ;;  %p2091_p4 = pneg %p2428_p0 }
  0x2d   : > { %s2102_s25 = scalar_lea.vmem %s465_s24, 128  ;;  %s2247_s13 = smov [#allocation2]  }
  0x2e   : > { %s462_s12 = scalar_lea.hbm %s2784_s0, %s1793_s14  ;;  %p2103_p5 = scmp.ne.s32.totalorder %s465_s24, %s2102_s25 }
  0x2f   : > { %s2107_s14 = sshll.u32 %s2247_s13, 4  ;;  %s2108_s14 = int_to_ptr.vmem [resolvable:$false] %s2107_s14 }
  0x30   : > { %p2105_p6 = pnand %p2103_p5, %p2091_p4  ;;  %s2109_s29 = scalar_lea.vmem %s2108_s14, 256 }
  0x31   : > { %p2110_p3 = scmp.lt.s32.totalorder %s465_s24, %s2108_s14  ;;  %p2111_p8 = scmp.lt.s32.totalorder %s2109_s29, %s2102_s25 }
  0x32   : > { %p2106_p7 = pneg %p2105_p6 }
  0x33   : > { %p2112_p12 = por %p2111_p8, %p2110_p3 }
  0x35   : > { %p2113_p13 = pnand %p2112_p12, %p2106_p7 }
  0x37   : > { %2116 = shalt.err (!%p2113_p13)
}
  0x38   : > { %1969 = dma.hbm_to_vmem [thread:$0]  (!%p2428_p0), %s462_s12, 128, %s465_s24, %s454_s23  }
  0x39   : > { %p2446_p5 = pnand %p1795_p1, %p566_p2  ;;  %s1794_s26 = sshll.u32 %s2241_s19, 4 }
  0x3a   : > { %s474_s28 = scalar_lea.vmem [#allocation5], %s2416_s21  ;;  %s2787_s1 = sld [smem:[#allocation25_spill]] }
  0x3b   : > { %s481_s25 = sshll.u32 %s474_s28, 4  ;;  %s472_s0 = scalar_lea.sflag [#allocation6], %s2416_s21  ;;  %s482_s25 = int_to_ptr.vmem [resolvable:$true] %s481_s25 }
  0x3c   : > { %s2130_s22 = scalar_lea.vmem %s482_s25, 16  ;;  %s2248_s12 = smov [#allocation5]  }
  0x3d   : > { %p2131_p6 = scmp.ne.s32.totalorder %s482_s25, %s2130_s22  ;;  %s2135_s24 = sshll.u32 %s2248_s12, 4  ;;  %s2136_s24 = int_to_ptr.vmem [resolvable:$false] %s2135_s24 }
  0x3e   : > { %s2137_s23 = scalar_lea.vmem %s2136_s24, 32  ;;  %p2138_p1 = scmp.lt.s32.totalorder %s482_s25, %s2136_s24 }
  0x3f   : > { %p2133_p7 = pnand %p2131_p6, %p2091_p4  ;;  %p2139_p2 = scmp.lt.s32.totalorder %s2137_s23, %s2130_s22 }
  0x40   : > { %s479_s29 = scalar_lea.hbm %s2787_s1, %s1794_s26 }
  0x41   : > { %p2134_p3 = pneg %p2133_p7  ;;  %p2140_p8 = por %p2139_p2, %p2138_p1 }
  0x43   : > { %p2141_p12 = pnand %p2140_p8, %p2134_p3 }
  0x45   : > { %2144 = shalt.err (!%p2141_p12)
}
  0x46   : > { %1972 = dma.hbm_to_vmem [thread:$0]  (!%p2428_p0), %s479_s29, 16, %s482_s25, %s472_s0  }
  0x47   : > { %570 = sbr.rel (%p2446_p5) target bundleno = 2536 (0x9e8), region = 76 }
  0x4c   : > { %s2464_s21 = sand.u32 1, %s2221_s30  }
  0x4d   : > { %2788 = sst [smem:[#allocation23_spill]] %s2464_s21  ;;  %s1796_s26 = sshll.u32 %s2464_s21, 3 }
  0x4e   : > { %s573_s28 = scalar_lea.sflag [#allocation3], %s2464_s21  ;;  %s576_s13 = scalar_lea.vmem [#allocation2], %s1796_s26 }
  0x4f   : > { %2204 = dma.done.wait (%p2400_p9), %s573_s28, 128  }
  0x50   : > { %2206 = vsyncadd (%p2400_p9), %s573_s28, 4294967168  ;;  %s582_s0 = scalar_lea.sflag [#allocation6], %s2464_s21 }
  0x51   : > { %2208 = dma.done.wait (%p2400_p9), %s582_s0, 16  }
  0x52   : > { %2210 = vsyncadd (%p2400_p9), %s582_s0, 4294967280  ;;  %p677_p0 = scmp.lt.s32.totalorder %s2229_s16, 1  ;;  %s2789_s2 = sld [smem:[#allocation26_spill]] }
  0x53   : > { %s2790_s4 = sld [smem:[#allocation27_spill]]  ;;  %s2534_s23 = scalar_lea.vmem [#allocation7], %s1796_s26 }
  0x54   : > { %s2480_s22 = scalar_select %p677_p0, %s2229_s16, 1 }
  0x55   : > { %s2792_s8 = sld [smem:[#allocation29_spill]]  ;;  %p1806_p9 = scmp.ne.s32.totalorder %s2229_s16, 0 }
  0x56   : > { %s1842_s17 = sshll.u32 %s2480_s22, 4  ;;  %s714_s21 = scalar_lea.vmem %s2741_s11, %s2480_s22 }
  0x57   : > { %s2793_s20 = sld [smem:[#allocation30_spill]] }
  0x58   : > { %s681_s24 = scalar_lea.vmem %s2789_s2, %s1842_s17  ;;  %s706_s2 = scalar_lea.vmem %s2739_s9, %s2480_s22 }
  0x59   : > { %s2493_s0 = scalar_lea.vmem %s2790_s4, %s1842_s17  ;;  %s1845_s4 = sshll.u32 %s2480_s22, 5 }
  0x5a   : > { %s2520_s19 = scalar_lea.vmem %s2740_s10, %s1845_s4 }
  0x5b   : > { %s2510_s12 = scalar_lea.vmem %s2792_s8, %s1842_s17  ;;  %s2794_s8 = sld [smem:[#allocation31_spill]] }
  0x5d   : > { %s717_s27 = scalar_lea.vmem %s2793_s20, %s2480_s22  ;;  %725 = sbr.rel (%p1806_p9) target bundleno = 100 (0x64), region = 88 }
  0x61   : > { %s720_s7 = scalar_lea.vmem %s2794_s8, %s2480_s22 }
  0x62   : > { %v726_v0 = vld [vmem:[%s576_s13] sm:$0xff]  ;;  %vm727_vm0 = vcmask 261120  }
  0x63   : > { %728 = vst.msk [vmem:[%s2534_s23] sm:$0xff] %vm727_vm0, %v726_v0 }
  0x64 PF: > { %v2059_v1 = vld [vmem:[%s681_s24 + $0x8] sm:$0xff]   ;;  %v2249_v2 = vmov 0.0   ;;  %v2060_v3 = vld [vmem:[%s681_s24] sm:$0xff]   ;;  %vm2250_vm1 = vmmov 0   ;;  %vm755_vm2 = vcmask 261120   ;;  %s2795_s16 = scalar_lea.vmem %s2733_s3, %s2480_s22  ;;  %s2251_s20 = smov 120  }
  0x65   : > { %1876 = vmatprep.subr.bf16.mxu0 %v2249_v2  ;;  %1884 = vmatprep.subr.bf16.mxu1 %v2249_v2  ;;  %v1807_v6 = vld [vmem:[%s2795_s16] ss:$0 sm:$0xff]  ;;  %s2252_s26 = smov 96   ;;  %s2253_s13 = smov 80   ;;  %vm803_vm3 = vcmask 64512   ;;  %vm875_vm4 = vcmask 1043456  }
  0x66   : > { %1877 = vmatpush3.bf16.msra.mxu0 %v2059_v1  ;;  %1880 = vmatprep.mubr.msk.bf16.mxu0 %vm2250_vm1, %v2249_v2  ;;  %s2254_s24 = smov 88   ;;  %s2255_s14 = smov 72   ;;  %vm1268_vm5 = vcmask 130048   ;;  %vm1270_vm6 = vcmask 195584   ;;  %vm1478_vm7 = vcmask 523264  }
  0x67   : > { %1878 = vmatprep.subr.bf16.mxu0 %v2249_v2  ;;  %1886 = vmatprep.mubr.msk.bf16.mxu1 %vm2250_vm1, %v2249_v2  ;;  %s2256_s28 = smov 112   ;;  %s2257_s1 = smov 104  }
  0x68   : > { %s2796_s18 = sld [smem:[#allocation23_spill]]  ;;  %s2258_s15 = smov 56  }
  0x69   : > { %s2259_s25 = smov 64   ;;  %s2260_s17 = smov 40  }
  0x6a   : > { %v2543_v4 = vld [vmem:[%s2534_s23] sm:$0xff]  ;;  %1879 = vmatpush3.bf16.msra.mxu0 %v2060_v3  ;;  %s2261_s29 = smov 48   ;;  %s2262_s4 = smov 8  }
  0x6b   : > { %v731_v5 = vpack.c.bf16 %v2543_v4, %v2543_v4  ;;  %1890 = vmatprep.subr.bf16.mxu0 %v2249_v2  ;;  %s2263_s8 = smov 16   ;;  %s2264_s16 = smov 24  }
  0x6d   : > { %1881 = vmatmul.mubr.msk.bf16.vlgmr.msra.gmra.mxu0 %vm755_vm2, %v731_v5 }
  0x6e   : > { %1892 = vmatprep.mubr.msk.bf16.mxu0 %vm2250_vm1, %v2249_v2  ;;  %s2797_s30 = scalar_lea.vmem [#allocation5], %s2796_s18 }
  0x6f   : > { %v1812_v25 = vld [vmem:[%s2797_s30] ss:$0 sm:$0xff] }
 0x12d   : > { %v793_v7 = vpop.f32.mrf.mxu0 }
 0x12e   : > { %v794_v8 = vadd.f32 %v1807_v6, %v793_v7 }
 0x12f   : > { %v1882_v9 = vpop.f32.mrf.mxu0 }
 0x130   : > { %v2559_v10 = vpack.c.bf16 %v794_v8, %v794_v8 }
 0x131   : > { %v796_v11 = vpop.f32.mrf.mxu0 }
 0x132   : > { %919 = vrot.lane.b32.xlu1 %v2559_v10, %s2251_s20  ;;  %801 = vrot.lane.b32.xlu0 %v2559_v10, %s2252_s26  ;;  %s2798_s26 = scalar_lea.vmem %s2735_s5, %s2480_s22 }
 0x133   : > { %v1883_v12 = vpop.f32.mrf.mxu0 }
 0x136   : > { %1033 = vrot.lane.b32.xlu1 %v2559_v10, %s2253_s13  ;;  %921 = vrot.lane.b32.xlu0 %v2559_v10, %s2254_s24  ;;  %s2799_s24 = scalar_lea.vmem %s2736_s6, %s2480_s22 }
 0x13a   : > { %1145 = vrot.lane.b32.xlu1 %v2559_v10, %s2255_s14  ;;  %1031 = vrot.lane.b32.xlu0 %v2559_v10, %s2256_s28  ;;  %s2806_s14 = sld [smem:[#allocation32_spill]] }
 0x13e   : > { %1143 = vrot.lane.b32.xlu0 %v2559_v10, %s2257_s1  ;;  %s2800_s1 = sld [smem:[#allocation28_spill]] }
 0x144   : > { %s2801_s30 = scalar_lea.vmem %s2800_s1, %s2480_s22  ;;  %s1554_s1 = scalar_lea.sflag [#allocation4], %s2796_s18 }
 0x1a4   : > { %v802_v13 = vpop.permute.xlu0 %801  ;;  %v920_v16 = vpop.permute.xlu1 %919 }
 0x1a5   : > { %v808_v14 = vsel %vm803_vm3, %v802_v13, 0 }
 0x1a6   : > { %1885 = vmatpush3.bf16.xpose.msra.mxu1 %v808_v14 }
 0x1a7   : > { %1896 = vmatprep.subr.bf16.mxu1 %v2249_v2 }
 0x1a8   : > { %v922_v15 = vpop.permute.xlu0 %921  ;;  %v1034_v18 = vpop.permute.xlu1 %1033 }
 0x1a9   : > { %v927_v17 = vsel %vm803_vm3, %v922_v15, 0  ;;  %v1039_v19 = vsel %vm803_vm3, %v1034_v18, 0 }
 0x1ac   : > { %v1146_v20 = vpop.permute.xlu1 %1145  ;;  %v1032_v21 = vpop.permute.xlu0 %1031 }
 0x1ad   : > { %1887 = vmatmul.mubr.msk.bf16.vlgmr.msra.gmra.mxu1 %vm803_vm3, %v2559_v10  ;;  %v1151_v22 = vsel %vm803_vm3, %v1146_v20, 0 }
 0x1ae   : > { %1897 = vmatpush3.bf16.xpose.msra.mxu1 %v927_v17  ;;  %1898 = vmatprep.mubr.msk.bf16.mxu1 %vm2250_vm1, %v2249_v2 }
 0x1af   : > { %1908 = vmatprep.subr.bf16.mxu1 %v2249_v2 }
 0x1b0   : > { %v1144_v23 = vpop.permute.xlu0 %1143 }
 0x1b5   : > { %1899 = vmatmul.mubr.msk.bf16.vlgmr.msra.gmra.mxu1 %vm803_vm3, %v920_v16 }
 0x1b6   : > { %1909 = vmatpush3.bf16.xpose.msra.mxu1 %v1039_v19  ;;  %1910 = vmatprep.mubr.msk.bf16.mxu1 %vm2250_vm1, %v2249_v2 }
 0x1b7   : > { %1920 = vmatprep.subr.bf16.mxu1 %v2249_v2 }
 0x1bd   : > { %1911 = vmatmul.mubr.msk.bf16.vlgmr.msra.gmra.mxu1 %vm803_vm3, %v1032_v21 }
 0x1be   : > { %1921 = vmatpush3.bf16.xpose.msra.mxu1 %v1151_v22  ;;  %1922 = vmatprep.mubr.msk.bf16.mxu1 %vm2250_vm1, %v2249_v2 }
 0x1bf   : > { %1932 = vmatprep.subr.bf16.mxu1 %v2249_v2 }
 0x1c5   : > { %1923 = vmatmul.mubr.msk.bf16.vlgmr.msra.gmra.mxu1 %vm803_vm3, %v1144_v23 }
 0x1c6   : > { %1936 = vmatprep.mubr.msk.bf16.mxu1 %vm2250_vm1, %v2249_v2 }
 0x26d   : > { %v844_v24 = vpop.f32.mrf.mxu1 }
 0x26e   : > { %v850_v26 = vmul.f32 0.35355338, %v844_v24 }
 0x26f   : > { %v1888_v27 = vpop.f32.mrf.mxu1 }
 0x270   : > { %v857_v28 = vadd.f32 %v1812_v25, %v850_v26 }
 0x271   : > { %v847_v29 = vpop.f32.mrf.mxu1 }
 0x272   : > { %v858_v30 = vsel %vm803_vm3, %v857_v28, -inf }
 0x273   : > { %859 = vmax.xlane.f32.xlu1 %v858_v30  ;;  %v1889_v31 = vpop.f32.mrf.mxu1 }
 0x275   : > { %v963_v32 = vpop.f32.mrf.mxu1 }
 0x276   : > { %v969_v33 = vmul.f32 0.35355338, %v963_v32 }
 0x277   : > { %v1900_v34 = vpop.f32.mrf.mxu1 }
 0x278   : > { %v970_v35 = vadd.f32 %v1812_v25, %v969_v33 }
 0x279   : > { %v966_v36 = vpop.f32.mrf.mxu1 }
 0x27a   : > { %v971_v37 = vsel %vm803_vm3, %v970_v35, -inf }
 0x27b   : > { %972 = vmax.xlane.f32.xlu0 %v971_v37  ;;  %v1901_v38 = vpop.f32.mrf.mxu1 }
 0x27d   : > { %v1075_v39 = vpop.f32.mrf.mxu1 }
 0x27e   : > { %v1081_v40 = vmul.f32 0.35355338, %v1075_v39 }
 0x27f   : > { %v1912_v41 = vpop.f32.mrf.mxu1 }
 0x280   : > { %v1082_v42 = vadd.f32 %v1812_v25, %v1081_v40 }
 0x281   : > { %v1078_v43 = vpop.f32.mrf.mxu1 }
 0x282   : > { %v1083_v44 = vsel %vm803_vm3, %v1082_v42, -inf  ;;  %v2061_v43 = vld [vmem:[%s2493_s0 + $0x8] sm:$0xff]  }
 0x283   : > { %1084 = vmax.xlane.f32.xlu0 %v1083_v44  ;;  %v1913_v45 = vpop.f32.mrf.mxu1  ;;  %1933 = vmatpush3.bf16.msra.mxu1 %v2061_v43  ;;  %v2062_v44 = vld [vmem:[%s2493_s0] sm:$0xff]  }
 0x284   : > { %1934 = vmatprep.subr.bf16.mxu1 %v2249_v2 }
 0x285   : > { %v1187_v46 = vpop.f32.mrf.mxu1 }
 0x286   : > { %v1193_v47 = vmul.f32 0.35355338, %v1187_v46 }
 0x287   : > { %v1924_v48 = vpop.f32.mrf.mxu1  ;;  %1935 = vmatpush3.bf16.msra.mxu1 %v2062_v44 }
 0x288   : > { %v1194_v49 = vadd.f32 %v1812_v25, %v1193_v47  ;;  %1948 = vmatprep.subr.bf16.mxu1 %v2249_v2 }
 0x289   : > { %v1190_v50 = vpop.f32.mrf.mxu1 }
 0x28a   : > { %v1195_v51 = vsel %vm803_vm3, %v1194_v49, -inf }
 0x28b   : > { %1196 = vmax.xlane.f32.xlu1 %v1195_v51  ;;  %v1925_v52 = vpop.f32.mrf.mxu1 }
 0x2fc   : > { %v860_v53 = vpop.xlane.xlu1 %859 }
 0x2fd   : > { %v861_v54 = vsub.f32 %v857_v28, %v860_v53 }
 0x2ff   : > { %v862_v55 = vmul.f32 1.442695, %v861_v54 }
 0x301   : > { %2069 = vpow2.f32 %v862_v55 }
 0x304   : > { %v973_v56 = vpop.xlane.xlu0 %972 }
 0x305   : > { %v974_v57 = vsub.f32 %v970_v35, %v973_v56 }
 0x307   : > { %v975_v58 = vmul.f32 1.442695, %v974_v57 }
 0x309   : > { %2071 = vpow2.f32 %v975_v58 }
 0x30c   : > { %v1085_v59 = vpop.xlane.xlu0 %1084 }
 0x30d   : > { %v1086_v60 = vsub.f32 %v1082_v42, %v1085_v59 }
 0x30e   : > { %v2070_v61 = vpop.eup %2069 }
 0x30f   : > { %v1087_v62 = vmul.f32 1.442695, %v1086_v60  ;;  %v864_v63 = vsel %vm803_vm3, %v2070_v61, 0.0  ;;  %v1820_v60 = vld [vmem:[%s2798_s26] ss:$0 sm:$0xff] }
 0x310   : > { %865 = vadd.xlane.f32.xlu0 %v864_v63 }
 0x311   : > { %2073 = vpow2.f32 %v1087_v62 }
 0x314   : > { %v1197_v6 = vpop.xlane.xlu1 %1196 }
 0x315   : > { %v1198_v7 = vsub.f32 %v1194_v49, %v1197_v6 }
 0x316   : > { %v2072_v0 = vpop.eup %2071 }
 0x317   : > { %v977_v1 = vsel %vm803_vm3, %v2072_v0, 0.0  ;;  %v1199_v8 = vmul.f32 1.442695, %v1198_v7 }
 0x318   : > { %978 = vadd.xlane.f32.xlu1 %v977_v1 }
 0x319   : > { %2075 = vpow2.f32 %v1199_v8 }
 0x31e   : > { %v2074_v3 = vpop.eup %2073 }
 0x31f   : > { %v1089_v5 = vsel %vm803_vm3, %v2074_v3, 0.0 }
 0x320   : > { %1090 = vadd.xlane.f32.xlu0 %v1089_v5 }
 0x326   : > { %v2076_v9 = vpop.eup %2075 }
 0x327   : > { %v1201_v11 = vsel %vm803_vm3, %v2076_v9, 0.0 }
 0x329   : > { %983 = vrot.lane.b32.xlu1 %v2559_v10, %s2258_s15 }
 0x336   : > { %870 = vrot.lane.b32.xlu0 %v2559_v10, %s2259_s25 }
 0x33a   : > { %1207 = vrot.lane.b32.xlu0 %v2559_v10, %s2260_s17 }
 0x34d   : > { %1202 = vadd.xlane.f32.xlu1 %v1201_v11 }
 0x35e   : > { %1095 = vrot.lane.b32.xlu1 %v2559_v10, %s2261_s29 }
 0x399   : > { %v866_v12 = vpop.xlane.xlu0 %865 }
 0x39a   : > { %2077 = vrcp.f32 %v866_v12  ;;  %v2063_v12 = vld [vmem:[%s2510_s12 + $0x8] sm:$0xff]  }
 0x3a1   : > { %v979_v13 = vpop.xlane.xlu1 %978 }
 0x3a2   : > { %2079 = vrcp.f32 %v979_v13  ;;  %v2064_v13 = vld [vmem:[%s2510_s12] sm:$0xff]   ;;  %s1567_s12 = sshll.u32 %s2534_s23, 4  ;;  %s1568_s12 = int_to_ptr.vmem [resolvable:$true] %s1567_s12 }
 0x3a5   : > { %v984_v19 = vpop.permute.xlu1 %983 }
 0x3a6   : > { %v989_v22 = vsel %vm875_vm4, %v984_v19, 0  ;;  %v1824_v19 = vld [vmem:[%s2799_s24] ss:$0 sm:$0xff] }
 0x3a7   : > { %v2078_v14 = vpop.eup %2077 }
 0x3a8   : > { %v868_v16 = vmul.f32 %v2078_v14, %v2070_v61  ;;  %v2066_v14 = vld [vmem:[%s2520_s19 + $0x10] sm:$0xff]  }
 0x3a9   : > { %v1091_v15 = vpop.xlane.xlu0 %1090 }
 0x3aa   : > { %v869_v20 = vpack.c.bf16 %v868_v16, %v868_v16  ;;  %2081 = vrcp.f32 %v1091_v15 }
 0x3ad   : > { %v871_v17 = vpop.permute.xlu0 %870 }
 0x3ae   : > { %v877_v18 = vsel %vm875_vm4, %v871_v17, 0 }
 0x3af   : > { %1891 = vmatpush3.bf16.msra.mxu0 %v877_v18  ;;  %v2080_v21 = vpop.eup %2079 }
 0x3b0   : > { %1902 = vmatprep.subr.bf16.mxu0 %v2249_v2  ;;  %v981_v10 = vmul.f32 %v2080_v21, %v2072_v0  ;;  %v1825_v21 = vld [vmem:[%s2801_s30] ss:$0 sm:$0xff]  ;;  %s2145_s30 = scalar_lea.vmem %s1568_s12, 128 }
 0x3b1   : > { %v1208_v29 = vpop.permute.xlu0 %1207  ;;  %p2146_p4 = scmp.ne.s32.totalorder %s1568_s12, %s2145_s30 }
 0x3b2   : > { %1893 = vmatmul.mubr.msk.bf16.vlgmr.msra.gmra.mxu0 %vm803_vm3, %v869_v20  ;;  %v982_v23 = vpack.c.bf16 %v981_v10, %v981_v10  ;;  %v1213_v31 = vsel %vm875_vm4, %v1208_v29, 0 }
 0x3b3   : > { %1903 = vmatpush3.bf16.msra.mxu0 %v989_v22  ;;  %1904 = vmatprep.mubr.msk.bf16.mxu0 %vm2250_vm1, %v2249_v2  ;;  %p2147_p13 = pnand %p2146_p4, %p2404_p10 }
 0x3b4   : > { %1914 = vmatprep.subr.bf16.mxu0 %v2249_v2 }
 0x3b5   : > { %p2148_p5 = pneg %p2147_p13 }
 0x3b7   : > { %v2082_v24 = vpop.eup %2081 }
 0x3b8   : > { %v1093_v26 = vmul.f32 %v2082_v24, %v2074_v3  ;;  %v2067_v24 = vld [vmem:[%s2520_s19 + $0x8] sm:$0xff]  }
 0x3ba   : > { %1905 = vmatmul.mubr.msk.bf16.vlgmr.msra.gmra.mxu0 %vm803_vm3, %v982_v23  ;;  %v1094_v30 = vpack.c.bf16 %v1093_v26, %v1093_v26  ;;  %v1826_v26 = vld [vmem:[%s706_s2] ss:$0 sm:$0xff]  ;;  %s2802_s2 = sld [smem:[#allocation14_spill]] }
 0x3bb   : > { %1916 = vmatprep.mubr.msk.bf16.mxu0 %vm2250_vm1, %v2249_v2 }
 0x3c0   : > { %s1839_s26 = sshll.u32 %s2802_s2, 7 }
 0x3c1   : > { %s1565_s28 = scalar_lea.hbm %s2806_s14, %s1839_s26 }
 0x3d6   : > { %v1203_v25 = vpop.xlane.xlu1 %1202 }
 0x3d7   : > { %2083 = vrcp.f32 %v1203_v25  ;;  %v2068_v25 = vld [vmem:[%s2520_s19] sm:$0xff]  }
 0x3da   : > { %v1096_v27 = vpop.permute.xlu1 %1095 }
 0x3db   : > { %v1101_v28 = vsel %vm875_vm4, %v1096_v27, 0 }
 0x3dc   : > { %1915 = vmatpush3.bf16.msra.mxu0 %v1101_v28 }
 0x3dd   : > { %1926 = vmatprep.subr.bf16.mxu0 %v2249_v2 }
 0x3df   : > { %1917 = vmatmul.mubr.msk.bf16.vlgmr.msra.gmra.mxu0 %vm803_vm3, %v1094_v30 }
 0x3e0   : > { %1927 = vmatpush3.bf16.msra.mxu0 %v1213_v31  ;;  %1928 = vmatprep.mubr.msk.bf16.mxu0 %vm2250_vm1, %v2249_v2 }
 0x3e1   : > { %1940 = vmatprep.subr.bf16.mxu0 %v2249_v2 }
 0x3e4   : > { %v2084_v32 = vpop.eup %2083 }
 0x3e5   : > { %v1205_v33 = vmul.f32 %v2084_v32, %v2076_v9 }
 0x3e7   : > { %v1206_v34 = vpack.c.bf16 %v1205_v33, %v1205_v33 }
 0x3e9   : > { %1929 = vmatmul.mubr.msk.bf16.vlgmr.msra.gmra.mxu0 %vm803_vm3, %v1206_v34 }
 0x3ea   : > { %1944 = vmatprep.mubr.msk.bf16.mxu0 %vm2250_vm1, %v2249_v2  ;;  %1941 = vmatpush3.bf16.msra.mxu0 %v2063_v12 }
 0x3eb   : > { %1942 = vmatprep.subr.bf16.mxu0 %v2249_v2 }
 0x3ee   : > { %1943 = vmatpush3.bf16.msra.mxu0 %v2064_v13 }
 0x472   : > { %v913_v35 = vpop.f32.mrf.mxu0 }
 0x474   : > { %v1894_v36 = vpop.f32.mrf.mxu0 }
 0x476   : > { %v916_v37 = vpop.f32.mrf.mxu0 }
 0x478   : > { %v1895_v38 = vpop.f32.mrf.mxu0 }
 0x47a   : > { %v1025_v39 = vpop.f32.mrf.mxu0 }
 0x47b   : > { %1256 = vrot.lane.b32.xlu1 %v1025_v39, %s2262_s4 }
 0x47c   : > { %v1906_v40 = vpop.f32.mrf.mxu0 }
 0x47e   : > { %v1028_v41 = vpop.f32.mrf.mxu0 }
 0x480   : > { %v1907_v42 = vpop.f32.mrf.mxu0 }
 0x49f   : > { %v1137_v45 = vpop.f32.mrf.mxu0 }
 0x4a0   : > { %1260 = vrot.lane.b32.xlu0 %v1137_v45, %s2263_s8 }
 0x4a1   : > { %v1918_v46 = vpop.f32.mrf.mxu0 }
 0x4a3   : > { %v1140_v47 = vpop.f32.mrf.mxu0 }
 0x4a5   : > { %v1919_v48 = vpop.f32.mrf.mxu0 }
 0x4a9   : > { %v1249_v49 = vpop.f32.mrf.mxu0 }
 0x4aa   : > { %1264 = vrot.lane.b32.xlu1 %v1249_v49, %s2264_s16 }
 0x4ab   : > { %v1930_v50 = vpop.f32.mrf.mxu0 }
 0x4ac   : > { %v1836_v50 = vld [vmem:[%s717_s27] ss:$0 sm:$0xff]  ;;  %s2265_s27 = smov [#allocation7]  }
 0x4ad   : > { %v1252_v51 = vpop.f32.mrf.mxu0  ;;  %s2149_s22 = sshll.u32 %s2265_s27, 4  ;;  %s2150_s22 = int_to_ptr.vmem [resolvable:$false] %s2149_s22 }
 0x4ae   : > { %p2152_p6 = scmp.lt.s32.totalorder %s1568_s12, %s2150_s22 }
 0x4af   : > { %v1931_v52 = vpop.f32.mrf.mxu0 }
 0x4b0   : > { %v1837_v52 = vld [vmem:[%s720_s7] ss:$0 sm:$0xff]  ;;  %s2151_s7 = scalar_lea.vmem %s2150_s22, 256 }
 0x4b1   : > { %p2153_p7 = scmp.lt.s32.totalorder %s2151_s7, %s2145_s30 }
 0x4b3   : > { %p2154_p3 = por %p2153_p7, %p2152_p6 }
 0x4b5   : > { %p2155_p1 = pnand %p2154_p3, %p2148_p5 }
 0x4ed   : > { %v1257_v53 = vpop.permute.xlu1 %1256 }
 0x4ee   : > { %v1267_v55 = vsel %vm803_vm3, %v913_v35, %v1257_v53 }
 0x512   : > { %v1261_v54 = vpop.permute.xlu0 %1260 }
 0x513   : > { %v1269_v56 = vsel %vm1268_vm5, %v1267_v55, %v1261_v54 }
 0x51c   : > { %v1265_v57 = vpop.permute.xlu1 %1264 }
 0x51d   : > { %v1271_v58 = vsel %vm1270_vm6, %v1269_v56, %v1265_v57 }
 0x51e   : > { %v1272_v59 = vpack.c.bf16 %v1271_v58, %v1271_v58 }
 0x520   : > { %1937 = vmatmul.mubr.msk.bf16.vlgmr.msra.gmra.mxu1 %vm755_vm2, %v1272_v59 }
 0x521   : > { %1956 = vmatprep.mubr.msk.bf16.mxu1 %vm2250_vm1, %v2249_v2 }
 0x5e0   : > { %v1333_v61 = vpop.f32.mrf.mxu1 }
 0x5e1   : > { %v1334_v62 = vadd.f32 %v1820_v60, %v1333_v61 }
 0x5e2   : > { %v1938_v63 = vpop.f32.mrf.mxu1 }
 0x5e3   : > { %v1339_v0 = vadd.f32 %v1334_v62, %v2543_v4  ;;  %v2065_v4 = vld [vmem:[%s2520_s19 + $0x18] sm:$0xff]  }
 0x5e4   : > { %v1336_v1 = vpop.f32.mrf.mxu1  ;;  %1949 = vmatpush3.bf16.msra.mxu1 %v2065_v4 }
 0x5e5   : > { %v1342_v3 = vsel %vm755_vm2, %v1339_v0, 0.0  ;;  %1950 = vmatprep.subr.bf16.mxu1 %v2249_v2 }
 0x5e6   : > { %1343 = vadd.xlane.f32.xlu0 %v1342_v3  ;;  %v1939_v5 = vpop.f32.mrf.mxu1 }
 0x5e8   : > { %1951 = vmatpush3.bf16.msra.mxu1 %v2066_v14 }
 0x5e9   : > { %1952 = vmatprep.subr.bf16.mxu1 %v2249_v2 }
 0x5ec   : > { %1953 = vmatpush3.bf16.msra.mxu1 %v2067_v24 }
 0x5ed   : > { %1954 = vmatprep.subr.bf16.mxu1 %v2249_v2  ;;  %v1830_v2 = vld [vmem:[%s714_s21] ss:$0 sm:$0xff] }
 0x5f0   : > { %1955 = vmatpush3.bf16.msra.mxu1 %v2068_v25 }
 0x66f   : > { %v1344_v6 = vpop.xlane.xlu0 %1343 }
 0x670   : > { %v1346_v7 = vmul.f32 0.03125, %v1344_v6 }
 0x672   : > { %v1347_v8 = vsub.f32 %v1339_v0, %v1346_v7 }
 0x674   : > { %v1348_v9 = vmul.f32 %v1347_v8, %v1347_v8 }
 0x676   : > { %v1349_v11 = vsel %vm755_vm2, %v1348_v9, 0.0 }
 0x677   : > { %1350 = vadd.xlane.f32.xlu1 %v1349_v11 }
 0x700   : > { %v1351_v15 = vpop.xlane.xlu1 %1350 }
 0x701   : > { %v1352_v16 = vmul.f32 0.03125, %v1351_v15 }
 0x703   : > { %v1353_v17 = vadd.f32 1e-05, %v1352_v16 }
 0x705   : > { %2085 = vrsqrt.f32 %v1353_v17 }
 0x712   : > { %v2086_v18 = vpop.eup %2085 }
 0x713   : > { %v1355_v20 = vmul.f32 %v2086_v18, %v1347_v8 }
 0x715   : > { %v1362_v22 = vmul.f32 %v1824_v19, %v1355_v20 }
 0x717   : > { %v1369_v10 = vadd.f32 %v1825_v21, %v1362_v22 }
 0x719   : > { %v1370_v23 = vpack.c.bf16 %v1369_v10, %v1369_v10 }
 0x71b   : > { %1945 = vmatmul.mubr.msk.bf16.vlgmr.msra.gmra.mxu0 %vm755_vm2, %v1370_v23 }
 0x7db   : > { %v1431_v27 = vpop.f32.mrf.mxu0 }
 0x7dc   : > { %v1432_v28 = vadd.f32 %v1826_v26, %v1431_v27 }
 0x7dd   : > { %v1946_v29 = vpop.f32.mrf.mxu0 }
 0x7de   : > { %v1437_v30 = vmax.f32 %v1432_v28, 0.0 }
 0x7df   : > { %v1434_v31 = vpop.f32.mrf.mxu0 }
 0x7e0   : > { %v1438_v32 = vpack.c.bf16 %v1437_v30, %v1437_v30 }
 0x7e1   : > { %v1947_v33 = vpop.f32.mrf.mxu0 }
 0x7e2   : > { %1957 = vmatmul.mubr.msk.bf16.vlgmr.msra.gmra.mxu1 %vm1478_vm7, %v1438_v32 }
 0x8a2   : > { %v1516_v34 = vpop.f32.mrf.mxu1 }
 0x8a3   : > { %v1517_v35 = vadd.f32 %v1830_v2, %v1516_v34 }
 0x8a4   : > { %v1958_v36 = vpop.f32.mrf.mxu1 }
 0x8a5   : > { %v1522_v37 = vadd.f32 %v1517_v35, %v1369_v10 }
 0x8a6   : > { %v1519_v38 = vpop.f32.mrf.mxu1 }
 0x8a7   : > { %v1525_v39 = vsel %vm755_vm2, %v1522_v37, 0.0 }
 0x8a8   : > { %1526 = vadd.xlane.f32.xlu0 %v1525_v39  ;;  %v1959_v40 = vpop.f32.mrf.mxu1 }
 0x931   : > { %v1527_v41 = vpop.xlane.xlu0 %1526 }
 0x932   : > { %v1528_v42 = vmul.f32 0.03125, %v1527_v41 }
 0x934   : > { %v1529_v43 = vsub.f32 %v1522_v37, %v1528_v42 }
 0x936   : > { %v1530_v44 = vmul.f32 %v1529_v43, %v1529_v43 }
 0x938   : > { %v1531_v45 = vsel %vm755_vm2, %v1530_v44, 0.0 }
 0x939   : > { %1532 = vadd.xlane.f32.xlu0 %v1531_v45 }
 0x9c2   : > { %v1533_v46 = vpop.xlane.xlu0 %1532 }
 0x9c3   : > { %v1534_v47 = vmul.f32 0.03125, %v1533_v46 }
 0x9c5   : > { %v1535_v48 = vadd.f32 1e-05, %v1534_v47 }
 0x9c7   : > { %2087 = vrsqrt.f32 %v1535_v48 }
 0x9d4   : > { %v2088_v49 = vpop.eup %2087 }
 0x9d5   : > { %v1537_v51 = vmul.f32 %v2088_v49, %v1529_v43 }
 0x9d7   : > { %v1544_v53 = vmul.f32 %v1836_v50, %v1537_v51 }
 0x9d9   : > { %v1551_v54 = vadd.f32 %v1837_v52, %v1544_v53 }
 0x9db   : > { %1552 = vst.msk [vmem:[%s2534_s23] sm:$0xff] %vm755_vm2, %v1551_v54 }
 0x9dc   : > { %2158 = shalt.err (!%p2155_p1)
}
 0x9dd   : > { %s2159_s15 = scalar_lea.hbm %s1565_s28, 128  ;;  %s2163_s25 = scalar_lea.hbm %s2806_s14, 256 }
 0x9de   : > { %p2160_p2 = scmp.ne.s32.totalorder %s1565_s28, %s2159_s15  ;;  %p2164_p0 = scmp.lt.s32.totalorder %s1565_s28, %s2806_s14 }
 0x9df   : > { %p2165_p9 = scmp.lt.s32.totalorder %s2163_s25, %s2159_s15 }
 0x9e0   : > { %p2161_p8 = pnand %p2160_p2, %p2404_p10 }
 0x9e1   : > { %p2166_p4 = por %p2165_p9, %p2164_p0 }
 0x9e2   : > { %p2162_p12 = pneg %p2161_p8 }
 0x9e4   : > { %p2167_p13 = pnand %p2166_p4, %p2162_p12 }
 0x9e6   : > { %2170 = shalt.err (!%p2167_p13)
}
 0x9e7   : > { %1964 = dma.vmem_to_hbm [thread:$0]  (%p2404_p10), %s1568_s12, 128, %s1565_s28, %s1554_s1  }
 0x9e8 PF: > { %s2807_s2 = sld [smem:[#allocation17_spill]] }
 0x9e9   : > { %s2808_s21 = sld [smem:[#allocation11_spill]] }
 0x9ee   : > { %p1978_p5 = scmp.ge.s32.totalorder %s2807_s2, 2 }
 0x9ef   : > { %s1579_s8 = sand.u32 1, %s2808_s21  }
 0x9f0   : > { %p1974_p6 = pnand %p1978_p5, %p2410_p11  ;;  %s1580_s16 = scalar_lea.sflag [#allocation4], %s1579_s8 }
 0x9f2   : > { %p1975_p7 = pneg %p1974_p6 }
 0x9f4   : > { %2212 = dma.done.wait (%p1975_p7), %s1580_s16, 128  }
 0x9f5   : > { %2214 = vsyncadd (%p1975_p7), %s1580_s16, 4294967168  ;;  %s33_s20 = sadd.s32 1, %s2807_s2   ;;  %s2810_s29 = sld [smem:[#allocation12_spill]] }
 0x9f6   : > { %p30_p3 = scmp.ge.s32.totalorder %s33_s20, 6   ;;  %s2811_s30 = sld [smem:[#allocation13_spill]] }
 0x9f7   : > { %s2812_s15 = sld [smem:[#allocation22_spill]] }
 0x9f8   : > { %s2813_s16 = sld [smem:[#allocation15_spill]]  ;;  %32 = sbr.rel (!%p30_p3) target bundleno = 19 (0x13), region = 174 }
 0x9f9   : > { %s2814_s17 = sld [smem:[#allocation16_spill]] }
 0x9fa   : > { %s2815_s18 = sld [smem:[#allocation18_spill]] }
 0x9fb   : > { %s2816_s19 = sld [smem:[#allocation19_spill]] }
 0x9fd   :  { %1585 = vsyncpa [#allocation3], 1 }
 0x9fe   :  { %1587 = vsyncpa [#allocation3 + $0x1], 1 }
 0x9ff   :  { %1588 = vsyncpa [#allocation6], 1 }
 0xa00   :  { %1590 = vsyncpa [#allocation6 + $0x1], 1 }
 0xa01   :  { %1591 = vsyncpa [#allocation4], 1 }
 0xa02   :  { %1593 = vsyncpa [#allocation4 + $0x1], 1 }

</bundles_post_ra>
